<compile_context>
chip_gen: v7x
topology: tpu7x:2x2x1
jax: 0.10.0
libtpu: 0.0.40
codegen_flags: <defaults>
</compile_context>

<pallas_src>
import functools

import jax
import jax.numpy as jnp
from jax.experimental import pallas as pl
from jax.experimental.pallas import tpu as pltpu


_VMEM_LIMIT_BYTES = 48 * 1024 * 1024  # > v5e's 16 MiB default, < v7x's 64 MiB physical


# -----------------------------------------------------------------------------
# Pass 1: node prep (once) + per-edge-tile message MLP + scatter-add into H1,
#         emits per-node classifier scalars rc = [r_row; c_row]  (2, N_pad).
# -----------------------------------------------------------------------------
def _aggregate_kernel(
    xt_ref,                                    # (D, Np)  f32  X^T (padded)
    w_in_t_ref, b_in_ref, bn_s_ref, bn_b_ref,  # inputnet (transposed/column)
    wa_h_ref, wa_x_ref, wb_h_ref, wb_x_ref,    # hoisted edge-MLP layer-1 weights
    b_e1_ref, w_e2_t_ref, b_e2_ref,            # edge-MLP biases / layer 2
    wrc_h_ref, wrc_x_ref,                      # hoisted classifier weights (2,Hd)/(2,D)
    nid_ref,                                   # (Np, 1)  int32 node-id column (resident)
    er_ref,                                    # (2, TE)  int32 [src_row; dst_row]
    rc_ref,                                    # out: (2, Np) f32 [r_row; c_row]
    pa_scr, pb_scr, h1_scr,                    # VMEM scratch
):
    i = pl.program_id(0)
    n_pad = xt_ref.shape[1]
    te = er_ref.shape[1]

    # ---- once: inputnet + hoisted per-node projections, zero the accumulator
    @pl.when(i == 0)
    def _init():
        xt = xt_ref[...]                                           # (D, Np)
        h0t = jnp.tanh(
            bn_s_ref[...]
            * (jnp.dot(w_in_t_ref[...], xt, preferred_element_type=jnp.float32)
               + b_in_ref[...])
            + bn_b_ref[...]
        )                                                          # (Hd, Np)
        pa = (jnp.dot(wa_h_ref[...], h0t, preferred_element_type=jnp.float32)
              + jnp.dot(wa_x_ref[...], xt, preferred_element_type=jnp.float32))
        pb = (jnp.dot(wb_h_ref[...], h0t, preferred_element_type=jnp.float32)
              + jnp.dot(wb_x_ref[...], xt, preferred_element_type=jnp.float32))
        pa_scr[...] = pa.astype(jnp.bfloat16)                      # (M, Np)
        pb_scr[...] = pb.astype(jnp.bfloat16)
        h1_scr[...] = jnp.zeros_like(h1_scr)

    # ---- per edge tile: gather (node->edge), edge MLP, scatter-add (edge->node)
    src_row = er_ref[0:1, :]                                       # (1, TE) int32
    dst_row = er_ref[1:2, :]
    # Hoisted node-id column, broadcast once and shared by both compares.
    nid_b = jnp.broadcast_to(nid_ref[...], (n_pad, te))            # (Np, TE) int32
    s_dst = (nid_b == dst_row).astype(jnp.bfloat16)                # (Np, TE) exact 0/1
    s_src = (nid_b == src_row).astype(jnp.bfloat16)

    m1 = (jnp.dot(pa_scr[...], s_dst, preferred_element_type=jnp.float32)
          + jnp.dot(pb_scr[...], s_src, preferred_element_type=jnp.float32)
          + b_e1_ref[...])                                         # (M, TE) f32
    m1 = jnp.maximum(m1, 0.0)
    m = jnp.maximum(
        jnp.dot(w_e2_t_ref[...], m1, preferred_element_type=jnp.float32)
        + b_e2_ref[...],
        0.0,
    )                                                              # (Hd, TE) f32

    # Scatter-add without a third one-hot: contract over the edge (lane) axis of
    # both m and s_dst (NT matmul, flash-attention style).
    h1_scr[...] += jax.lax.dot_general(
        m.astype(jnp.bfloat16), s_dst,
        dimension_numbers=(((1,), (1,)), ((), ())),
        preferred_element_type=jnp.float32,
    )                                                              # (Hd, Np)

    # ---- once at the end: per-node classifier scalars r, c
    @pl.when(i == pl.num_programs(0) - 1)
    def _finalize():
        rc_ref[...] = (
            jnp.dot(wrc_h_ref[...], h1_scr[...], preferred_element_type=jnp.float32)
            + jnp.dot(wrc_x_ref[...], xt_ref[...], preferred_element_type=jnp.float32))


# -----------------------------------------------------------------------------
# Pass 2: per edge tile, gather r[src] + c[dst] + b and apply sigmoid.
#         Output is lane-dense (1, TE) blocks of a (1, E_pad) row.
# -----------------------------------------------------------------------------
def _classify_kernel(rc_ref, b_out_ref, nid_ref, er_ref, out_ref):
    n_pad = rc_ref.shape[1]
    te = er_ref.shape[1]
    src_row = er_ref[0:1, :]
    dst_row = er_ref[1:2, :]
    nid_b = jnp.broadcast_to(nid_ref[...], (n_pad, te))
    s_src = (nid_b == src_row).astype(jnp.bfloat16)                # (Np, TE)
    s_dst = (nid_b == dst_row).astype(jnp.bfloat16)
    rc = rc_ref[...].astype(jnp.bfloat16)                          # (2, Np)
    logit = (jnp.dot(rc[0:1, :], s_src, preferred_element_type=jnp.float32)
             + jnp.dot(rc[1:2, :], s_dst, preferred_element_type=jnp.float32)
             + b_out_ref[...])                                     # (1, TE) f32
    out_ref[...] = jax.nn.sigmoid(logit)


# -----------------------------------------------------------------------------
# Wrapper: parameter plumbing / padding (glue) + the two pallas_calls
# -----------------------------------------------------------------------------
@functools.partial(jax.jit, static_argnames=("tile_e",))
def edgenet2_forward(X, edge_index, params, tile_e=512):
    assert tile_e % 128 == 0
    N, D = X.shape
    E = edge_index.shape[1]
    Hd = params["w_in"].shape[1]
    M = params["w_e2"].shape[0]

    # ---- pad nodes (keep >=1 dummy node for padded edges); 16-aligned for bf16
    #      sublane packing, 128-aligned (lane-dense slabs) for larger graphs.
    align = 128 if N >= 512 else 16
    n_pad = ((N + 1 + align - 1) // align) * align
    dummy = n_pad - 1                       # >= N, never aliases a real node
    e_pad = max(1, -(-E // tile_e)) * tile_e
    n_tiles = e_pad // tile_e

    x_t = jnp.zeros((D, n_pad), jnp.float32).at[:, :N].set(X.T)
    src = edge_index[0].astype(jnp.int32)
    dst = edge_index[1].astype(jnp.int32)
    er = (jnp.full((2, e_pad), dummy, jnp.int32)
          .at[0, :E].set(src).at[1, :E].set(dst))                  # (2, E_pad)
    nid = jnp.arange(n_pad, dtype=jnp.int32).reshape(n_pad, 1)     # (Np, 1)

    # ---- fold eval-mode BatchNorm, transpose weights, hoist through gathers
    bn_scale = params["bn_gamma"] / jnp.sqrt(params["bn_var"] + 1e-5)
    bn_shift = params["bn_beta"] - params["bn_mean"] * bn_scale

    W1 = params["w_e1"]                      # (2*(Hd+D), M)
    wi_h, wi_x = W1[0:Hd], W1[Hd:Hd + D]
    wd_h, wd_x = W1[Hd + D:2 * Hd + D], W1[2 * Hd + D:]
    wa_h_t, wa_x_t = (wi_h - wd_h).T, (wi_x - wd_x).T      # multiply x_i (dst)
    wb_h_t, wb_x_t = wd_h.T, wd_x.T                        # multiply x_j (src)

    Wo = params["w_out"]                     # (2*(Hd+D), 1)
    wrc_h = jnp.stack([Wo[0:Hd, 0], Wo[Hd + D:2 * Hd + D, 0]], axis=0)   # (2, Hd)
    wrc_x = jnp.stack([Wo[Hd:Hd + D, 0], Wo[2 * Hd + D:, 0]], axis=0)    # (2, D)

    resident = lambda shape: pl.BlockSpec(shape, lambda i: (0, 0))

    pass1_inputs = (
        x_t,
        params["w_in"].T, params["b_in"].reshape(Hd, 1),
        bn_scale.reshape(Hd, 1), bn_shift.reshape(Hd, 1),
        wa_h_t, wa_x_t, wb_h_t, wb_x_t,
        params["b_e1"].reshape(M, 1), params["w_e2"].T, params["b_e2"].reshape(Hd, 1),
        wrc_h, wrc_x,
        nid,
    )
    pass1_specs = [resident(a.shape) for a in pass1_inputs] + [
        pl.BlockSpec((2, tile_e), lambda i: (0, i)),      # er tile
    ]

    rc = pl.pallas_call(
        _aggregate_kernel,
        out_shape=jax.ShapeDtypeStruct((2, n_pad), jnp.float32),
        grid_spec=pltpu.PrefetchScalarGridSpec(
            num_scalar_prefetch=0,
            grid=(n_tiles,),
            in_specs=pass1_specs,
            out_specs=pl.BlockSpec((2, n_pad), lambda i: (0, 0)),
            scratch_shapes=[
                pltpu.VMEM((M, n_pad), jnp.bfloat16),     # Pa
                pltpu.VMEM((M, n_pad), jnp.bfloat16),     # Pb
                pltpu.VMEM((Hd, n_pad), jnp.float32),     # H1^T accumulator
            ],
        ),
        compiler_params=pltpu.CompilerParams(
            dimension_semantics=("arbitrary",),
            vmem_limit_bytes=_VMEM_LIMIT_BYTES,
        ),
    )(*pass1_inputs, er)

    out_row = pl.pallas_call(
        _classify_kernel,
        out_shape=jax.ShapeDtypeStruct((1, e_pad), jnp.float32),
        grid_spec=pltpu.PrefetchScalarGridSpec(
            num_scalar_prefetch=0,
            grid=(n_tiles,),
            in_specs=[
                pl.BlockSpec((2, n_pad), lambda i: (0, 0)),   # rc (resident)
                pl.BlockSpec((1, 1), lambda i: (0, 0)),       # b_out
                pl.BlockSpec((n_pad, 1), lambda i: (0, 0)),   # node ids (resident)
                pl.BlockSpec((2, tile_e), lambda i: (0, i)),  # er tile
            ],
            out_specs=pl.BlockSpec((1, tile_e), lambda i: (0, i)),
        ),
        compiler_params=pltpu.CompilerParams(
            dimension_semantics=("parallel",),
            vmem_limit_bytes=_VMEM_LIMIT_BYTES,
        ),
    )(rc, params["b_out"].reshape(1, 1), nid, er)

    return out_row[0, :E]                                   # (E,)


# -----------------------------------------------------------------------------
# Pure-JAX reference (f32) for a numerical sanity check
# -----------------------------------------------------------------------------
def edgenet2_ref(X, edge_index, params):
    src, dst = edge_index[0], edge_index[1]
    bn_scale = params["bn_gamma"] / jnp.sqrt(params["bn_var"] + 1e-5)
    bn_shift = params["bn_beta"] - params["bn_mean"] * bn_scale
    H0 = jnp.tanh((X @ params["w_in"] + params["b_in"]) * bn_scale + bn_shift)
    xcat = jnp.concatenate([H0, X], -1)
    x_i, x_j = xcat[dst], xcat[src]
    ef = jnp.concatenate([x_i, x_j - x_i], -1)
    m = jax.nn.relu(ef @ params["w_e1"] + params["b_e1"])
    m = jax.nn.relu(m @ params["w_e2"] + params["b_e2"])
    H1 = jax.ops.segment_sum(m, dst, num_segments=X.shape[0])
    hcat = jnp.concatenate([H1, X], -1)
    logit = jnp.concatenate([hcat[src], hcat[dst]], -1) @ params["w_out"] + params["b_out"]
    return jax.nn.sigmoid(logit)[:, 0]


# -----------------------------------------------------------------------------
# Deterministic parameter init + example graph
# -----------------------------------------------------------------------------
def init_params(key, input_dim=3, hidden_dim=8, output_dim=1, n_iters=1):
    D, Hd = input_dim, hidden_dim
    M = (3 * Hd + 2 * D) // 2
    keys = jax.random.split(key, 12)
    n = jax.random.normal
    return {
        "w_in":  0.3 * n(keys[0], (D, Hd), jnp.float32),
        "b_in":  0.1 * n(keys[1], (Hd,), jnp.float32),
        "bn_gamma": 1.0 + 0.1 * n(keys[2], (Hd,), jnp.float32),
        "bn_beta":  0.1 * n(keys[3], (Hd,), jnp.float32),
        "bn_mean":  jnp.zeros((Hd,), jnp.float32),
        "bn_var":   jnp.ones((Hd,), jnp.float32),
        "w_e1": 0.3 * n(keys[4], (2 * (Hd + D), M), jnp.float32),
        "b_e1": 0.1 * n(keys[5], (M,), jnp.float32),
        "w_e2": 0.3 * n(keys[6], (M, Hd), jnp.float32),
        "b_e2": 0.1 * n(keys[7], (Hd,), jnp.float32),
        "w_out": 0.3 * n(keys[8], (2 * (n_iters * Hd + D), output_dim), jnp.float32),
        "b_out": 0.1 * n(keys[9], (output_dim,), jnp.float32),
    }


if __name__ == "__main__":
    key = jax.random.PRNGKey(0)
    k_x, k_src, k_dst, k_p = jax.random.split(key, 4)

    N, D, E = 16, 3, 32                       # small graph: 16 nodes, 32 directed edges
    X = jax.random.normal(k_x, (N, D), jnp.float32)
    src = jax.random.randint(k_src, (E,), 0, N, jnp.int32)
    dst = jax.random.randint(k_dst, (E,), 0, N, jnp.int32)
    edge_index = jnp.stack([src, dst], axis=0)   # (2, E)

    params = init_params(k_p, input_dim=D, hidden_dim=8, output_dim=1, n_iters=1)

    out = edgenet2_forward(X, edge_index, params)   # default tile_e=512
    out = jax.block_until_ready(out)

    ref = jax.block_until_ready(edgenet2_ref(X, edge_index, params))
    assert out.shape == (E,)
    # bf16 one-hot/projection operands (f32 accumulation) => loosened tolerance.
    assert jnp.allclose(out, ref, atol=1e-2, rtol=1e-2), (out, ref)

    print("KERNEL_OK")
</pallas_src>

<mosaic_0001>
module attributes {stable_mosaic.version = 11 : i64} {
  func.func @_classify_kernel(%arg0: i32, %arg1: memref<2x32xf32, #tpu.memory_space<vmem>>, %arg2: memref<1x1xf32, #tpu.memory_space<vmem>>, %arg3: memref<32x1xi32, #tpu.memory_space<vmem>>, %arg4: memref<2x512xi32, #tpu.memory_space<vmem>>, %arg5: memref<1x512xf32, #tpu.memory_space<vmem>>) attributes {dimension_semantics = [#tpu.dimension_semantics<parallel>], iteration_bounds = array<i64: 1>, scalar_prefetch = 0 : i64, scratch_operands = 0 : i64, tpu.core_type = #tpu.core_type<tc>, window_params = [{pipeline_mode = #tpu.pipeline_mode<synchronous>, transform_indices = @transform_0, window_bounds = array<i64: 2, 32>}, {pipeline_mode = #tpu.pipeline_mode<synchronous>, transform_indices = @transform_1, window_bounds = array<i64: 1, 1>}, {pipeline_mode = #tpu.pipeline_mode<synchronous>, transform_indices = @transform_2, window_bounds = array<i64: 32, 1>}, {transform_indices = @transform_3, window_bounds = array<i64: 2, 512>}, {transform_indices = @transform_4, window_bounds = array<i64: 1, 512>}]} {
    %c0 = arith.constant 0 : index
    %c0_0 = arith.constant 0 : index
    %0 = vector.load %arg4[%c0, %c0_0] : memref<2x512xi32, #tpu.memory_space<vmem>>, vector<1x512xi32>
    %c1 = arith.constant 1 : index
    %c0_1 = arith.constant 0 : index
    %1 = vector.load %arg4[%c1, %c0_1] : memref<2x512xi32, #tpu.memory_space<vmem>>, vector<1x512xi32>
    %c0_2 = arith.constant 0 : index
    %c0_3 = arith.constant 0 : index
    %2 = vector.load %arg3[%c0_2, %c0_3] : memref<32x1xi32, #tpu.memory_space<vmem>>, vector<32x1xi32>
    %3 = vector.shape_cast %2 : vector<32x1xi32> to vector<32x1xi32>
    %4 = vector.broadcast %3 : vector<32x1xi32> to vector<32x512xi32>
    %5 = vector.broadcast %0 : vector<1x512xi32> to vector<32x512xi32>
    %6 = arith.cmpi eq, %4, %5 : vector<32x512xi32>
    %7 = arith.extui %6 : vector<32x512xi1> to vector<32x512xi32>
    %8 = arith.sitofp %7 : vector<32x512xi32> to vector<32x512xf32>
    %9 = arith.truncf %8 : vector<32x512xf32> to vector<32x512xbf16>
    %10 = vector.broadcast %1 : vector<1x512xi32> to vector<32x512xi32>
    %11 = arith.cmpi eq, %4, %10 : vector<32x512xi32>
    %12 = arith.extui %11 : vector<32x512xi1> to vector<32x512xi32>
    %13 = arith.sitofp %12 : vector<32x512xi32> to vector<32x512xf32>
    %14 = arith.truncf %13 : vector<32x512xf32> to vector<32x512xbf16>
    %c0_4 = arith.constant 0 : index
    %c0_5 = arith.constant 0 : index
    %15 = vector.load %arg1[%c0_4, %c0_5] : memref<2x32xf32, #tpu.memory_space<vmem>>, vector<2x32xf32>
    %16 = arith.truncf %15 : vector<2x32xf32> to vector<2x32xbf16>
    %17 = vector.extract_strided_slice %16 {offsets = [0, 0], sizes = [1, 32], strides = [1, 1]} : vector<2x32xbf16> to vector<1x32xbf16>
    %cst = arith.constant dense<0.000000e+00> : vector<1x512xf32>
    %18 = tpu.matmul %17, %9, %cst {dimension_numbers = #tpu.dot_dimension_numbers<[1], [0], [0], [1], [0, 0, 1, 1], [], []>} : vector<1x32xbf16>, vector<32x512xbf16>, vector<1x512xf32> -> vector<1x512xf32>
    %19 = vector.extract_strided_slice %16 {offsets = [1, 0], sizes = [1, 32], strides = [1, 1]} : vector<2x32xbf16> to vector<1x32xbf16>
    %cst_6 = arith.constant dense<0.000000e+00> : vector<1x512xf32>
    %20 = tpu.matmul %19, %14, %cst_6 {dimension_numbers = #tpu.dot_dimension_numbers<[1], [0], [0], [1], [0, 0, 1, 1], [], []>} : vector<1x32xbf16>, vector<32x512xbf16>, vector<1x512xf32> -> vector<1x512xf32>
    %21 = arith.addf %18, %20 : vector<1x512xf32>
    %c0_7 = arith.constant 0 : index
    %c0_8 = arith.constant 0 : index
    %22 = vector.load %arg2[%c0_7, %c0_8] : memref<1x1xf32, #tpu.memory_space<vmem>>, vector<1x1xf32>
    %23 = vector.broadcast %22 : vector<1x1xf32> to vector<1x512xf32>
    %24 = arith.addf %21, %23 : vector<1x512xf32>
    %25 = arith.negf %24 : vector<1x512xf32>
    %26 = math.exp %25 : vector<1x512xf32>
    %cst_9 = arith.constant 1.000000e+00 : f32
    %27 = vector.broadcast %cst_9 : f32 to vector<1x512xf32>
    %28 = arith.addf %27, %26 : vector<1x512xf32>
    %29 = arith.divf %27, %28 : vector<1x512xf32>
    %c0_10 = arith.constant 0 : index
    %c0_11 = arith.constant 0 : index
    %30 = vector.load %arg5[%c0_10, %c0_11] : memref<1x512xf32, #tpu.memory_space<vmem>>, vector<1x512xf32>
    tpu.vector_store %arg5[%c0_10, %c0_11], %29 {strides = array<i32>} : memref<1x512xf32, #tpu.memory_space<vmem>>, vector<1x512xf32>,
    return
  }
  func.func @transform_0(%arg0: i32) -> (i32, i32) {
    %c0_i32 = arith.constant 0 : i32
    %c0_i32_0 = arith.constant 0 : i32
    %c0_i32_1 = arith.constant 0 : i32
    return %c0_i32, %c0_i32_0 : i32, i32
  }
  func.func @transform_1(%arg0: i32) -> (i32, i32) {
    %c0_i32 = arith.constant 0 : i32
    %c0_i32_0 = arith.constant 0 : i32
    %c0_i32_1 = arith.constant 0 : i32
    return %c0_i32, %c0_i32_0 : i32, i32
  }
  func.func @transform_2(%arg0: i32) -> (i32, i32) {
    %c0_i32 = arith.constant 0 : i32
    %c0_i32_0 = arith.constant 0 : i32
    %c0_i32_1 = arith.constant 0 : i32
    return %c0_i32, %c0_i32_0 : i32, i32
  }
  func.func @transform_3(%arg0: i32) -> (i32, i32) {
    %c0_i32 = arith.constant 0 : i32
    %c0_i32_0 = arith.constant 0 : i32
    return %c0_i32, %arg0 : i32, i32
  }
  func.func @transform_4(%arg0: i32) -> (i32, i32) {
    %c0_i32 = arith.constant 0 : i32
    %c0_i32_0 = arith.constant 0 : i32
    return %c0_i32, %arg0 : i32, i32
  }
}

module attributes {stable_mosaic.version = 11 : i64} {
  func.func @_aggregate_kernel(%arg0: i32, %arg1: memref<3x32xf32, #tpu.memory_space<vmem>>, %arg2: memref<8x3xf32, #tpu.memory_space<vmem>>, %arg3: memref<8x1xf32, #tpu.memory_space<vmem>>, %arg4: memref<8x1xf32, #tpu.memory_space<vmem>>, %arg5: memref<8x1xf32, #tpu.memory_space<vmem>>, %arg6: memref<15x8xf32, #tpu.memory_space<vmem>>, %arg7: memref<15x3xf32, #tpu.memory_space<vmem>>, %arg8: memref<15x8xf32, #tpu.memory_space<vmem>>, %arg9: memref<15x3xf32, #tpu.memory_space<vmem>>, %arg10: memref<15x1xf32, #tpu.memory_space<vmem>>, %arg11: memref<8x15xf32, #tpu.memory_space<vmem>>, %arg12: memref<8x1xf32, #tpu.memory_space<vmem>>, %arg13: memref<2x8xf32, #tpu.memory_space<vmem>>, %arg14: memref<2x3xf32, #tpu.memory_space<vmem>>, %arg15: memref<32x1xi32, #tpu.memory_space<vmem>>, %arg16: memref<2x512xi32, #tpu.memory_space<vmem>>, %arg17: memref<2x32xf32, #tpu.memory_space<vmem>>, %arg18: memref<15x32xbf16, #tpu.memory_space<vmem>>, %arg19: memref<15x32xbf16, #tpu.memory_space<vmem>>, %arg20: memref<8x32xf32, #tpu.memory_space<vmem>>) attributes {dimension_semantics = [#tpu.dimension_semantics<arbitrary>], iteration_bounds = array<i64: 1>, scalar_prefetch = 0 : i64, scratch_operands = 3 : i64, tpu.core_type = #tpu.core_type<tc>, window_params = [{pipeline_mode = #tpu.pipeline_mode<synchronous>, transform_indices = @transform_0, window_bounds = array<i64: 3, 32>}, {pipeline_mode = #tpu.pipeline_mode<synchronous>, transform_indices = @transform_1, window_bounds = array<i64: 8, 3>}, {pipeline_mode = #tpu.pipeline_mode<synchronous>, transform_indices = @transform_2, window_bounds = array<i64: 8, 1>}, {pipeline_mode = #tpu.pipeline_mode<synchronous>, transform_indices = @transform_3, window_bounds = array<i64: 8, 1>}, {pipeline_mode = #tpu.pipeline_mode<synchronous>, transform_indices = @transform_4, window_bounds = array<i64: 8, 1>}, {pipeline_mode = #tpu.pipeline_mode<synchronous>, transform_indices = @transform_5, window_bounds = array<i64: 15, 8>}, {pipeline_mode = #tpu.pipeline_mode<synchronous>, transform_indices = @transform_6, window_bounds = array<i64: 15, 3>}, {pipeline_mode = #tpu.pipeline_mode<synchronous>, transform_indices = @transform_7, window_bounds = array<i64: 15, 8>}, {pipeline_mode = #tpu.pipeline_mode<synchronous>, transform_indices = @transform_8, window_bounds = array<i64: 15, 3>}, {pipeline_mode = #tpu.pipeline_mode<synchronous>, transform_indices = @transform_9, window_bounds = array<i64: 15, 1>}, {pipeline_mode = #tpu.pipeline_mode<synchronous>, transform_indices = @transform_10, window_bounds = array<i64: 8, 15>}, {pipeline_mode = #tpu.pipeline_mode<synchronous>, transform_indices = @transform_11, window_bounds = array<i64: 8, 1>}, {pipeline_mode = #tpu.pipeline_mode<synchronous>, transform_indices = @transform_12, window_bounds = array<i64: 2, 8>}, {pipeline_mode = #tpu.pipeline_mode<synchronous>, transform_indices = @transform_13, window_bounds = array<i64: 2, 3>}, {pipeline_mode = #tpu.pipeline_mode<synchronous>, transform_indices = @transform_14, window_bounds = array<i64: 32, 1>}, {transform_indices = @transform_15, window_bounds = array<i64: 2, 512>}, {pipeline_mode = #tpu.pipeline_mode<synchronous>, transform_indices = @transform_16, window_bounds = array<i64: 2, 32>}]} {
    %c0_i32 = arith.constant 0 : i32
    %0 = arith.cmpi eq, %arg0, %c0_i32 : i32
    %1 = arith.extui %0 : i1 to i32
    %c0_i32_0 = arith.constant 0 : i32
    %2 = arith.cmpi ne, %1, %c0_i32_0 : i32
    scf.if %2 {
      %c0_26 = arith.constant 0 : index
      %c0_27 = arith.constant 0 : index
      %43 = vector.load %arg1[%c0_26, %c0_27] : memref<3x32xf32, #tpu.memory_space<vmem>>, vector<3x32xf32>
      %c0_28 = arith.constant 0 : index
      %c0_29 = arith.constant 0 : index
      %44 = vector.load %arg4[%c0_28, %c0_29] : memref<8x1xf32, #tpu.memory_space<vmem>>, vector<8x1xf32>
      %c0_30 = arith.constant 0 : index
      %c0_31 = arith.constant 0 : index
      %45 = vector.load %arg2[%c0_30, %c0_31] : memref<8x3xf32, #tpu.memory_space<vmem>>, vector<8x3xf32>
      %cst_32 = arith.constant dense<0.000000e+00> : vector<8x32xf32>
      %46 = tpu.matmul %45, %43, %cst_32 {dimension_numbers = #tpu.dot_dimension_numbers<[1], [0], [0], [1], [0, 0, 1, 1], [], []>} : vector<8x3xf32>, vector<3x32xf32>, vector<8x32xf32> -> vector<8x32xf32>
      %c0_33 = arith.constant 0 : index
      %c0_34 = arith.constant 0 : index
      %47 = vector.load %arg3[%c0_33, %c0_34] : memref<8x1xf32, #tpu.memory_space<vmem>>, vector<8x1xf32>
      %48 = vector.broadcast %47 : vector<8x1xf32> to vector<8x32xf32>
      %49 = arith.addf %46, %48 : vector<8x32xf32>
      %50 = vector.broadcast %44 : vector<8x1xf32> to vector<8x32xf32>
      %51 = arith.mulf %50, %49 : vector<8x32xf32>
      %c0_35 = arith.constant 0 : index
      %c0_36 = arith.constant 0 : index
      %52 = vector.load %arg5[%c0_35, %c0_36] : memref<8x1xf32, #tpu.memory_space<vmem>>, vector<8x1xf32>
      %53 = vector.broadcast %52 : vector<8x1xf32> to vector<8x32xf32>
      %54 = arith.addf %51, %53 : vector<8x32xf32>
      %55 = math.tanh %54 : vector<8x32xf32>
      %c0_37 = arith.constant 0 : index
      %c0_38 = arith.constant 0 : index
      %56 = vector.load %arg6[%c0_37, %c0_38] : memref<15x8xf32, #tpu.memory_space<vmem>>, vector<15x8xf32>
      %cst_39 = arith.constant dense<0.000000e+00> : vector<15x32xf32>
      %57 = tpu.matmul %56, %55, %cst_39 {dimension_numbers = #tpu.dot_dimension_numbers<[1], [0], [0], [1], [0, 0, 1, 1], [], []>} : vector<15x8xf32>, vector<8x32xf32>, vector<15x32xf32> -> vector<15x32xf32>
      %c0_40 = arith.constant 0 : index
      %c0_41 = arith.constant 0 : index
      %58 = vector.load %arg7[%c0_40, %c0_41] : memref<15x3xf32, #tpu.memory_space<vmem>>, vector<15x3xf32>
      %cst_42 = arith.constant dense<0.000000e+00> : vector<15x32xf32>
      %59 = tpu.matmul %58, %43, %cst_42 {dimension_numbers = #tpu.dot_dimension_numbers<[1], [0], [0], [1], [0, 0, 1, 1], [], []>} : vector<15x3xf32>, vector<3x32xf32>, vector<15x32xf32> -> vector<15x32xf32>
      %60 = arith.addf %57, %59 : vector<15x32xf32>
      %c0_43 = arith.constant 0 : index
      %c0_44 = arith.constant 0 : index
      %61 = vector.load %arg8[%c0_43, %c0_44] : memref<15x8xf32, #tpu.memory_space<vmem>>, vector<15x8xf32>
      %cst_45 = arith.constant dense<0.000000e+00> : vector<15x32xf32>
      %62 = tpu.matmul %61, %55, %cst_45 {dimension_numbers = #tpu.dot_dimension_numbers<[1], [0], [0], [1], [0, 0, 1, 1], [], []>} : vector<15x8xf32>, vector<8x32xf32>, vector<15x32xf32> -> vector<15x32xf32>
      %c0_46 = arith.constant 0 : index
      %c0_47 = arith.constant 0 : index
      %63 = vector.load %arg9[%c0_46, %c0_47] : memref<15x3xf32, #tpu.memory_space<vmem>>, vector<15x3xf32>
      %cst_48 = arith.constant dense<0.000000e+00> : vector<15x32xf32>
      %64 = tpu.matmul %63, %43, %cst_48 {dimension_numbers = #tpu.dot_dimension_numbers<[1], [0], [0], [1], [0, 0, 1, 1], [], []>} : vector<15x3xf32>, vector<3x32xf32>, vector<15x32xf32> -> vector<15x32xf32>
      %65 = arith.addf %62, %64 : vector<15x32xf32>
      %66 = arith.truncf %60 : vector<15x32xf32> to vector<15x32xbf16>
      %c0_49 = arith.constant 0 : index
      %c0_50 = arith.constant 0 : index
      %67 = vector.load %arg18[%c0_49, %c0_50] : memref<15x32xbf16, #tpu.memory_space<vmem>>, vector<15x32xbf16>
      tpu.vector_store %arg18[%c0_49, %c0_50], %66 {strides = array<i32>} : memref<15x32xbf16, #tpu.memory_space<vmem>>, vector<15x32xbf16>,
      %68 = arith.truncf %65 : vector<15x32xf32> to vector<15x32xbf16>
      %c0_51 = arith.constant 0 : index
      %c0_52 = arith.constant 0 : index
      %69 = vector.load %arg19[%c0_51, %c0_52] : memref<15x32xbf16, #tpu.memory_space<vmem>>, vector<15x32xbf16>
      tpu.vector_store %arg19[%c0_51, %c0_52], %68 {strides = array<i32>} : memref<15x32xbf16, #tpu.memory_space<vmem>>, vector<15x32xbf16>,
      %cst_53 = arith.constant 0.000000e+00 : f32
      %70 = vector.broadcast %cst_53 : f32 to vector<8x32xf32>
      %c0_54 = arith.constant 0 : index
      %c0_55 = arith.constant 0 : index
      %71 = vector.load %arg20[%c0_54, %c0_55] : memref<8x32xf32, #tpu.memory_space<vmem>>, vector<8x32xf32>
      tpu.vector_store %arg20[%c0_54, %c0_55], %70 {strides = array<i32>} : memref<8x32xf32, #tpu.memory_space<vmem>>, vector<8x32xf32>,
    } else {
    }
    %c0 = arith.constant 0 : index
    %c0_1 = arith.constant 0 : index
    %3 = vector.load %arg16[%c0, %c0_1] : memref<2x512xi32, #tpu.memory_space<vmem>>, vector<1x512xi32>
    %c1 = arith.constant 1 : index
    %c0_2 = arith.constant 0 : index
    %4 = vector.load %arg16[%c1, %c0_2] : memref<2x512xi32, #tpu.memory_space<vmem>>, vector<1x512xi32>
    %c0_3 = arith.constant 0 : index
    %c0_4 = arith.constant 0 : index
    %5 = vector.load %arg15[%c0_3, %c0_4] : memref<32x1xi32, #tpu.memory_space<vmem>>, vector<32x1xi32>
    %6 = vector.shape_cast %5 : vector<32x1xi32> to vector<32x1xi32>
    %7 = vector.broadcast %6 : vector<32x1xi32> to vector<32x512xi32>
    %8 = vector.broadcast %4 : vector<1x512xi32> to vector<32x512xi32>
    %9 = arith.cmpi eq, %7, %8 : vector<32x512xi32>
    %10 = arith.extui %9 : vector<32x512xi1> to vector<32x512xi32>
    %11 = arith.sitofp %10 : vector<32x512xi32> to vector<32x512xf32>
    %12 = arith.truncf %11 : vector<32x512xf32> to vector<32x512xbf16>
    %13 = vector.broadcast %3 : vector<1x512xi32> to vector<32x512xi32>
    %14 = arith.cmpi eq, %7, %13 : vector<32x512xi32>
    %15 = arith.extui %14 : vector<32x512xi1> to vector<32x512xi32>
    %16 = arith.sitofp %15 : vector<32x512xi32> to vector<32x512xf32>
    %17 = arith.truncf %16 : vector<32x512xf32> to vector<32x512xbf16>
    %c0_5 = arith.constant 0 : index
    %c0_6 = arith.constant 0 : index
    %18 = vector.load %arg18[%c0_5, %c0_6] : memref<15x32xbf16, #tpu.memory_space<vmem>>, vector<15x32xbf16>
    %cst = arith.constant dense<0.000000e+00> : vector<15x512xf32>
    %19 = tpu.matmul %18, %12, %cst {dimension_numbers = #tpu.dot_dimension_numbers<[1], [0], [0], [1], [0, 0, 1, 1], [], []>} : vector<15x32xbf16>, vector<32x512xbf16>, vector<15x512xf32> -> vector<15x512xf32>
    %c0_7 = arith.constant 0 : index
    %c0_8 = arith.constant 0 : index
    %20 = vector.load %arg19[%c0_7, %c0_8] : memref<15x32xbf16, #tpu.memory_space<vmem>>, vector<15x32xbf16>
    %cst_9 = arith.constant dense<0.000000e+00> : vector<15x512xf32>
    %21 = tpu.matmul %20, %17, %cst_9 {dimension_numbers = #tpu.dot_dimension_numbers<[1], [0], [0], [1], [0, 0, 1, 1], [], []>} : vector<15x32xbf16>, vector<32x512xbf16>, vector<15x512xf32> -> vector<15x512xf32>
    %22 = arith.addf %19, %21 : vector<15x512xf32>
    %c0_10 = arith.constant 0 : index
    %c0_11 = arith.constant 0 : index
    %23 = vector.load %arg10[%c0_10, %c0_11] : memref<15x1xf32, #tpu.memory_space<vmem>>, vector<15x1xf32>
    %24 = vector.broadcast %23 : vector<15x1xf32> to vector<15x512xf32>
    %25 = arith.addf %22, %24 : vector<15x512xf32>
    %cst_12 = arith.constant 0.000000e+00 : f32
    %26 = vector.broadcast %cst_12 : f32 to vector<15x512xf32>
    %27 = arith.maximumf %25, %26 : vector<15x512xf32>
    %c0_13 = arith.constant 0 : index
    %c0_14 = arith.constant 0 : index
    %28 = vector.load %arg11[%c0_13, %c0_14] : memref<8x15xf32, #tpu.memory_space<vmem>>, vector<8x15xf32>
    %cst_15 = arith.constant dense<0.000000e+00> : vector<8x512xf32>
    %29 = tpu.matmul %28, %27, %cst_15 {dimension_numbers = #tpu.dot_dimension_numbers<[1], [0], [0], [1], [0, 0, 1, 1], [], []>} : vector<8x15xf32>, vector<15x512xf32>, vector<8x512xf32> -> vector<8x512xf32>
    %c0_16 = arith.constant 0 : index
    %c0_17 = arith.constant 0 : index
    %30 = vector.load %arg12[%c0_16, %c0_17] : memref<8x1xf32, #tpu.memory_space<vmem>>, vector<8x1xf32>
    %31 = vector.broadcast %30 : vector<8x1xf32> to vector<8x512xf32>
    %32 = arith.addf %29, %31 : vector<8x512xf32>
    %cst_18 = arith.constant 0.000000e+00 : f32
    %33 = vector.broadcast %cst_18 : f32 to vector<8x512xf32>
    %34 = arith.maximumf %32, %33 : vector<8x512xf32>
    %c0_19 = arith.constant 0 : index
    %c0_20 = arith.constant 0 : index
    %35 = vector.load %arg20[%c0_19, %c0_20] : memref<8x32xf32, #tpu.memory_space<vmem>>, vector<8x32xf32>
    %36 = arith.truncf %34 : vector<8x512xf32> to vector<8x512xbf16>
    %cst_21 = arith.constant dense<0.000000e+00> : vector<8x32xf32>
    %37 = tpu.matmul %36, %12, %cst_21 {dimension_numbers = #tpu.dot_dimension_numbers<[1], [1], [0], [0], [0, 0, 1, 0], [], []>} : vector<8x512xbf16>, vector<32x512xbf16>, vector<8x32xf32> -> vector<8x32xf32>
    %38 = arith.addf %35, %37 : vector<8x32xf32>
    %c0_22 = arith.constant 0 : index
    %c0_23 = arith.constant 0 : index
    %39 = vector.load %arg20[%c0_22, %c0_23] : memref<8x32xf32, #tpu.memory_space<vmem>>, vector<8x32xf32>
    tpu.vector_store %arg20[%c0_22, %c0_23], %38 {strides = array<i32>} : memref<8x32xf32, #tpu.memory_space<vmem>>, vector<8x32xf32>,
    %c0_i32_24 = arith.constant 0 : i32
    %40 = arith.cmpi eq, %arg0, %c0_i32_24 : i32
    %41 = arith.extui %40 : i1 to i32
    %c0_i32_25 = arith.constant 0 : i32
    %42 = arith.cmpi ne, %41, %c0_i32_25 : i32
    scf.if %42 {
      %c0_26 = arith.constant 0 : index
      %c0_27 = arith.constant 0 : index
      %43 = vector.load %arg13[%c0_26, %c0_27] : memref<2x8xf32, #tpu.memory_space<vmem>>, vector<2x8xf32>
      %c0_28 = arith.constant 0 : index
      %c0_29 = arith.constant 0 : index
      %44 = vector.load %arg20[%c0_28, %c0_29] : memref<8x32xf32, #tpu.memory_space<vmem>>, vector<8x32xf32>
      %cst_30 = arith.constant dense<0.000000e+00> : vector<2x32xf32>
      %45 = tpu.matmul %43, %44, %cst_30 {dimension_numbers = #tpu.dot_dimension_numbers<[1], [0], [0], [1], [0, 0, 1, 1], [], []>} : vector<2x8xf32>, vector<8x32xf32>, vector<2x32xf32> -> vector<2x32xf32>
      %c0_31 = arith.constant 0 : index
      %c0_32 = arith.constant 0 : index
      %46 = vector.load %arg14[%c0_31, %c0_32] : memref<2x3xf32, #tpu.memory_space<vmem>>, vector<2x3xf32>
      %c0_33 = arith.constant 0 : index
      %c0_34 = arith.constant 0 : index
      %47 = vector.load %arg1[%c0_33, %c0_34] : memref<3x32xf32, #tpu.memory_space<vmem>>, vector<3x32xf32>
      %cst_35 = arith.constant dense<0.000000e+00> : vector<2x32xf32>
      %48 = tpu.matmul %46, %47, %cst_35 {dimension_numbers = #tpu.dot_dimension_numbers<[1], [0], [0], [1], [0, 0, 1, 1], [], []>} : vector<2x3xf32>, vector<3x32xf32>, vector<2x32xf32> -> vector<2x32xf32>
      %49 = arith.addf %45, %48 : vector<2x32xf32>
      %c0_36 = arith.constant 0 : index
      %c0_37 = arith.constant 0 : index
      %50 = vector.load %arg17[%c0_36, %c0_37] : memref<2x32xf32, #tpu.memory_space<vmem>>, vector<2x32xf32>
      tpu.vector_store %arg17[%c0_36, %c0_37], %49 {strides = array<i32>} : memref<2x32xf32, #tpu.memory_space<vmem>>, vector<2x32xf32>,
    } else {
    }
    return
  }
  func.func @transform_0(%arg0: i32) -> (i32, i32) {
    %c0_i32 = arith.constant 0 : i32
    %c0_i32_0 = arith.constant 0 : i32
    %c0_i32_1 = arith.constant 0 : i32
    return %c0_i32, %c0_i32_0 : i32, i32
  }
  func.func @transform_1(%arg0: i32) -> (i32, i32) {
    %c0_i32 = arith.constant 0 : i32
    %c0_i32_0 = arith.constant 0 : i32
    %c0_i32_1 = arith.constant 0 : i32
    return %c0_i32, %c0_i32_0 : i32, i32
  }
  func.func @transform_2(%arg0: i32) -> (i32, i32) {
    %c0_i32 = arith.constant 0 : i32
    %c0_i32_0 = arith.constant 0 : i32
    %c0_i32_1 = arith.constant 0 : i32
    return %c0_i32, %c0_i32_0 : i32, i32
  }
  func.func @transform_3(%arg0: i32) -> (i32, i32) {
    %c0_i32 = arith.constant 0 : i32
    %c0_i32_0 = arith.constant 0 : i32
    %c0_i32_1 = arith.constant 0 : i32
    return %c0_i32, %c0_i32_0 : i32, i32
  }
  func.func @transform_4(%arg0: i32) -> (i32, i32) {
    %c0_i32 = arith.constant 0 : i32
    %c0_i32_0 = arith.constant 0 : i32
    %c0_i32_1 = arith.constant 0 : i32
    return %c0_i32, %c0_i32_0 : i32, i32
  }
  func.func @transform_5(%arg0: i32) -> (i32, i32) {
    %c0_i32 = arith.constant 0 : i32
    %c0_i32_0 = arith.constant 0 : i32
    %c0_i32_1 = arith.constant 0 : i32
    return %c0_i32, %c0_i32_0 : i32, i32
  }
  func.func @transform_6(%arg0: i32) -> (i32, i32) {
    %c0_i32 = arith.constant 0 : i32
    %c0_i32_0 = arith.constant 0 : i32
    %c0_i32_1 = arith.constant 0 : i32
    return %c0_i32, %c0_i32_0 : i32, i32
  }
  func.func @transform_7(%arg0: i32) -> (i32, i32) {
    %c0_i32 = arith.constant 0 : i32
    %c0_i32_0 = arith.constant 0 : i32
    %c0_i32_1 = arith.constant 0 : i32
    return %c0_i32, %c0_i32_0 : i32, i32
  }
  func.func @transform_8(%arg0: i32) -> (i32, i32) {
    %c0_i32 = arith.constant 0 : i32
    %c0_i32_0 = arith.constant 0 : i32
    %c0_i32_1 = arith.constant 0 : i32
    return %c0_i32, %c0_i32_0 : i32, i32
  }
  func.func @transform_9(%arg0: i32) -> (i32, i32) {
    %c0_i32 = arith.constant 0 : i32
    %c0_i32_0 = arith.constant 0 : i32
    %c0_i32_1 = arith.constant 0 : i32
    return %c0_i32, %c0_i32_0 : i32, i32
  }
  func.func @transform_10(%arg0: i32) -> (i32, i32) {
    %c0_i32 = arith.constant 0 : i32
    %c0_i32_0 = arith.constant 0 : i32
    %c0_i32_1 = arith.constant 0 : i32
    return %c0_i32, %c0_i32_0 : i32, i32
  }
  func.func @transform_11(%arg0: i32) -> (i32, i32) {
    %c0_i32 = arith.constant 0 : i32
    %c0_i32_0 = arith.constant 0 : i32
    %c0_i32_1 = arith.constant 0 : i32
    return %c0_i32, %c0_i32_0 : i32, i32
  }
  func.func @transform_12(%arg0: i32) -> (i32, i32) {
    %c0_i32 = arith.constant 0 : i32
    %c0_i32_0 = arith.constant 0 : i32
    %c0_i32_1 = arith.constant 0 : i32
    return %c0_i32, %c0_i32_0 : i32, i32
  }
  func.func @transform_13(%arg0: i32) -> (i32, i32) {
    %c0_i32 = arith.constant 0 : i32
    %c0_i32_0 = arith.constant 0 : i32
    %c0_i32_1 = arith.constant 0 : i32
    return %c0_i32, %c0_i32_0 : i32, i32
  }
  func.func @transform_14(%arg0: i32) -> (i32, i32) {
    %c0_i32 = arith.constant 0 : i32
    %c0_i32_0 = arith.constant 0 : i32
    %c0_i32_1 = arith.constant 0 : i32
    return %c0_i32, %c0_i32_0 : i32, i32
  }
  func.func @transform_15(%arg0: i32) -> (i32, i32) {
    %c0_i32 = arith.constant 0 : i32
    %c0_i32_0 = arith.constant 0 : i32
    return %c0_i32, %arg0 : i32, i32
  }
  func.func @transform_16(%arg0: i32) -> (i32, i32) {
    %c0_i32 = arith.constant 0 : i32
    %c0_i32_0 = arith.constant 0 : i32
    %c0_i32_1 = arith.constant 0 : i32
    return %c0_i32, %c0_i32_0 : i32, i32
  }
}

</mosaic_0001>

<bundles_post_ra>
// kernel: edgenet2_forward.3
= control target key start
LH: loop header
LB: loop body
LE: loop exit
PB: predicated region body
PF: predicated region fallthrough
CT: control target
= control target key end

     0   :  { %v528_v0 = vmov 0   ;;  %v39_v7 = vlaneseq  ;;  %v529_v24 = vmov 1.0|1.0   ;;  %s663_s2 = inlined_call_operand.vmem [shape: s32[32,1], index: 2, kind: input, shape index: {}]   ;;  %s664_s1 = inlined_call_operand.<no memory space> [shape: f32[1,1], index: 1, kind: input, shape index: {}]   ;;  %s665_s3 = inlined_call_operand.vmem [shape: s32[2,512], index: 3, kind: input, shape index: {}]   ;;  %s666_s0 = inlined_call_operand.vmem [shape: f32[2,32], index: 0, kind: input, shape index: {}]   ;;  %s667_s4 = inlined_call_operand.vmem [shape: f32[1,512], index: 4, kind: output, shape index: {}]  }
   0x1   :  { %511 = vset.pattern.permute.xlu1 %v528_v0  ;;  %510 = vset.pattern.permute.xlu0 %v528_v0  ;;  %v25_v1 = vld [vmem:[%s663_s2 + $0x10] sm:$0xff]  ;;  %v23_v2 = vld [vmem:[%s663_s2] sm:$0xff]  ;;  %v9_v3 = vstv %s664_s1  ;;  %v26_v4 = vld [vmem:[%s663_s2 + $0x18] sm:$0xff] }
   0x2   :  { %34 = vperm.xlu1 %511, %v25_v1   ;;  %28 = vperm.xlu0 %510, %v23_v2   ;;  %10 = vst [vmem:[#allocation2] sm:$0x1] %v9_v3  ;;  %v24_v5 = vld [vmem:[%s663_s2 + $0x8] sm:$0xff]  ;;  %v576_v8 = vshrl.u32 %v39_v7, 7  ;;  %v183_v22 = vld [vmem:[%s666_s0] sm:$0x3] }
   0x3   :  { %224 = vmatprep.mubr.bf16.mxu0 %v528_v0  ;;  %265 = vmatprep.mubr.bf16.mxu1 %v528_v0  ;;  %v434_v10 = vld [vmem:[%s665_s3 + $0x1] ss:$2 sm:$0xf]  ;;  %v20_v23 = vld [vmem:[%s665_s3] ss:$2 sm:$0xf]  ;;  %v184_v25 = vpack.c.bf16 %v183_v22, %v183_v22 }
   0x4   :  { %v45_v9 = vsub.s32 1, %v576_v8  ;;  %v53_v11 = vsub.s32 3, %v576_v8  ;;  %v584_v12 = vsub.s32 0, %v576_v8  ;;  %v49_v15 = vsub.s32 2, %v576_v8 }
   0x5   :  { %v186_v29 = vshrl.u32 %v184_v25, 16 }
   0x6   :  { %37 = vperm.xlu1 %511, %v26_v4   ;;  %31 = vperm.xlu0 %510, %v24_v5   ;;  %v118_v16 = vrot.slane %v434_v10, %v45_v9  ;;  %v126_v17 = vrot.slane %v434_v10, %v53_v11  ;;  %v114_v18 = vrot.slane %v434_v10, %v584_v12  ;;  %v530_v5 = vmov 1966171168  }
   0x7   :  { %v122_v21 = vrot.slane %v434_v10, %v49_v15  ;;  %v46_v26 = vrot.slane %v20_v23, %v45_v9  ;;  %v54_v27 = vrot.slane %v20_v23, %v53_v11  ;;  %v42_v28 = vrot.slane %v20_v23, %v584_v12 }
   0x8   :  { %v50_v30 = vrot.slane %v20_v23, %v49_v15 }
   0x9   :  { %v358_v6 = vld [vmem:[#allocation2] sm:$0x1] }
   0xa   :  { %361 = vperm.xlu0 %510, %v358_v6   ;;  %v403_v6 = vunpack.c.l.s4 %v530_v5 }
   0xc   :  { %v404_v9 = vunpack.c.0.s8 %v403_v6 }
  0x81   :  { %v586_v13 = vpop.permute.xlu1 %34  ;;  %v588_v14 = vpop.permute.xlu0 %28 }
  0x82   :  { %vm128_vm0 = vcmp.eq.s32.totalorder %v588_v14, %v118_v16  ;;  %vm130_vm5 = vcmp.eq.s32.totalorder %v588_v14, %v126_v17  ;;  %vm127_vm8 = vcmp.eq.s32.totalorder %v588_v14, %v114_v18  ;;  %vm136_vm9 = vcmp.eq.s32.totalorder %v586_v13, %v118_v16 }
  0x83   :  { %vm129_vm12 = vcmp.eq.s32.totalorder %v588_v14, %v122_v21  ;;  %vm138_vm13 = vcmp.eq.s32.totalorder %v586_v13, %v126_v17 }
  0x85   :  { %v592_v19 = vpop.permute.xlu1 %37  ;;  %v594_v20 = vpop.permute.xlu0 %31 }
  0x86   :  { %vm132_vm1 = vcmp.eq.s32.totalorder %v594_v20, %v118_v16  ;;  %vm134_vm2 = vcmp.eq.s32.totalorder %v594_v20, %v126_v17  ;;  %vm131_vm3 = vcmp.eq.s32.totalorder %v594_v20, %v114_v18  ;;  %vm133_vm6 = vcmp.eq.s32.totalorder %v594_v20, %v122_v21 }
  0x87   :  { %vm467_vm4 = vmpackc.low %vm132_vm1, %vm128_vm0  ;;  %vm140_vm10 = vcmp.eq.s32.totalorder %v592_v19, %v118_v16  ;;  %vm142_vm14 = vcmp.eq.s32.totalorder %v592_v19, %v126_v17  ;;  %vm135_vm0 = vcmp.eq.s32.totalorder %v586_v13, %v114_v18  ;;  %vm139_vm1 = vcmp.eq.s32.totalorder %v592_v19, %v114_v18 }
  0x88   :  { %468 = vmatprep.subr.msk.bf16.mxu0 %vm467_vm4, %v529_v24  ;;  %vm476_vm7 = vmpackc.low %vm134_vm2, %vm130_vm5  ;;  %vm141_vm4 = vcmp.eq.s32.totalorder %v592_v19, %v122_v21 }
  0x89   :  { %477 = vmatprep.subr.msk.bf16.mxu1 %vm476_vm7, %v529_v24  ;;  %vm469_vm11 = vmpackc.low %vm131_vm3, %vm127_vm8  ;;  %vm137_vm3 = vcmp.eq.s32.totalorder %v586_v13, %v122_v21  ;;  %vm60_vm7 = vcmp.eq.s32.totalorder %v594_v20, %v46_v26  ;;  %vm62_vm8 = vcmp.eq.s32.totalorder %v594_v20, %v54_v27  ;;  %v362_v39 = vpop.permute.xlu0 %361 }
  0x8a   :  { %470 = vmatpush1.bf16.msk.msra.mxu0 %vm469_vm11, %v529_v24  ;;  %vm478_vm15 = vmpackc.low %vm133_vm6, %vm129_vm12  ;;  %vm188_vm11 = vcmask 261120   ;;  %vm59_vm12 = vcmp.eq.s32.totalorder %v594_v20, %v42_v28  ;;  %v367_v41 = vrot.slane %v362_v39, %v584_v12  ;;  %v407_v12 = vsub.s32 %v404_v9, %v576_v8 }
  0x8b   :  { %479 = vmatpush1.bf16.msk.msra.mxu1 %vm478_vm15, %v529_v24  ;;  %vm471_vm2 = vmpackc.low %vm140_vm10, %vm136_vm9  ;;  %vm56_vm10 = vcmp.eq.s32.totalorder %v588_v14, %v46_v26  ;;  %vm61_vm15 = vcmp.eq.s32.totalorder %v594_v20, %v50_v30 }
  0x8c   :  { %472 = vmatprep.subr.msk.bf16.mxu0 %vm471_vm2, %v529_v24  ;;  %vm480_vm5 = vmpackc.low %vm142_vm14, %vm138_vm13  ;;  %vm58_vm14 = vcmp.eq.s32.totalorder %v588_v14, %v54_v27  ;;  %vm64_vm2 = vcmp.eq.s32.totalorder %v586_v13, %v46_v26 }
  0x8d   :  { %481 = vmatprep.subr.msk.bf16.mxu1 %vm480_vm5, %v529_v24  ;;  %vm473_vm6 = vmpackc.low %vm139_vm1, %vm135_vm0  ;;  %vm55_vm1 = vcmp.eq.s32.totalorder %v588_v14, %v42_v28  ;;  %vm57_vm5 = vcmp.eq.s32.totalorder %v588_v14, %v50_v30 }
  0x8e   :  { %474 = vmatpush1.bf16.msk.msra.mxu0 %vm473_vm6, %v529_v24  ;;  %vm482_vm9 = vmpackc.low %vm141_vm4, %vm137_vm3  ;;  %vm68_vm3 = vcmp.eq.s32.totalorder %v592_v19, %v46_v26  ;;  %vm70_vm6 = vcmp.eq.s32.totalorder %v592_v19, %v54_v27 }
  0x8f   :  { %483 = vmatpush1.bf16.msk.msra.mxu1 %vm482_vm9, %v529_v24  ;;  %vm485_vm13 = vmpackc.low %vm60_vm7, %vm56_vm10  ;;  %vm66_vm7 = vcmp.eq.s32.totalorder %v586_v13, %v54_v27  ;;  %vm63_vm9 = vcmp.eq.s32.totalorder %v586_v13, %v42_v28  ;;  %vm67_vm10 = vcmp.eq.s32.totalorder %v592_v19, %v42_v28 }
  0x90   :  { %486 = vmatprep.subr.msk.bf16.mxu0 %vm485_vm13, %v529_v24  ;;  %vm494_vm0 = vmpackc.low %vm62_vm8, %vm58_vm14  ;;  %vm69_vm14 = vcmp.eq.s32.totalorder %v592_v19, %v50_v30 }
  0x91   :  { %495 = vmatprep.subr.msk.bf16.mxu1 %vm494_vm0, %v529_v24  ;;  %475 = vmatmul.mubr.msk.bf16.vlgmr.msra.gmra.mrb[0].mxu0 %vm188_vm11, %v186_v29  ;;  %vm487_vm4 = vmpackc.low %vm59_vm12, %vm55_vm1  ;;  %vm65_vm12 = vcmp.eq.s32.totalorder %v586_v13, %v50_v30 }
  0x92   :  { %484 = vmatmul.mubr.msk.bf16.vlgmr.msra.gmra.mrb[0].mxu1 %vm188_vm11, %v186_v29  ;;  %488 = vmatpush1.bf16.msk.msra.mxu0 %vm487_vm4, %v529_v24  ;;  %vm496_vm8 = vmpackc.low %vm61_vm15, %vm57_vm5 }
  0x93   :  { %497 = vmatpush1.bf16.msk.msra.mxu1 %vm496_vm8, %v529_v24  ;;  %vm489_vm13 = vmpackc.low %vm68_vm3, %vm64_vm2  ;;  %308 = vmatprep.mubr.bf16.mxu0 %v528_v0 }
  0x94   :  { %490 = vmatprep.subr.msk.bf16.mxu0 %vm489_vm13, %v529_v24  ;;  %vm498_vm0 = vmpackc.low %vm70_vm6, %vm66_vm7  ;;  %349 = vmatprep.mubr.bf16.mxu1 %v528_v0 }
  0x95   :  { %499 = vmatprep.subr.msk.bf16.mxu1 %vm498_vm0, %v529_v24  ;;  %vm491_vm15 = vmpackc.low %vm67_vm10, %vm63_vm9 }
  0x96   :  { %492 = vmatpush1.bf16.msk.msra.mxu0 %vm491_vm15, %v529_v24  ;;  %vm500_vm1 = vmpackc.low %vm69_vm14, %vm65_vm12 }
  0x97   :  { %501 = vmatpush1.bf16.msk.msra.mxu1 %vm500_vm1, %v529_v24 }
  0x99   :  { %493 = vmatmul.mubr.msk.bf16.vlgmr.msra.gmra.mrb[4].mxu0 %vm188_vm11, %v184_v25 }
  0x9a   :  { %502 = vmatmul.mubr.msk.bf16.vlgmr.msra.gmra.mrb[4].mxu1 %vm188_vm11, %v184_v25  ;;  %vm427_vm11 = vcmp.lt.s32.totalorder %v39_v7, 512 }
 0x164   :  { %v226_v31 = vpop.f32.mrb[0].mxu0 }
 0x165   :  { %v267_v32 = vpop.f32.mrb[0].mxu1  ;;  %v228_v33 = vpop.f32.mrb[1].mxu0 }
 0x166   :  { %v269_v34 = vpop.f32.mrb[1].mxu1  ;;  %v230_v35 = vpop.f32.mrb[2].mxu0 }
 0x167   :  { %v271_v36 = vpop.f32.mrb[2].mxu1  ;;  %v231_v37 = vpop.f32.mrb[3].mxu0 }
 0x168   :  { %v272_v38 = vpop.f32.mrb[3].mxu1 }
 0x16c   :  { %v310_v40 = vpop.f32.mrb[4].mxu0 }
 0x16d   :  { %v311_v42 = vadd.f32 %v310_v40, %v226_v31  ;;  %v351_v43 = vpop.f32.mrb[4].mxu1  ;;  %v312_v44 = vpop.f32.mrb[5].mxu0 }
 0x16e   :  { %v352_v45 = vadd.f32 %v351_v43, %v267_v32  ;;  %v313_v46 = vadd.f32 %v312_v44, %v228_v33  ;;  %v353_v47 = vpop.f32.mrb[5].mxu1  ;;  %v314_v48 = vpop.f32.mrb[6].mxu0 }
 0x16f   :  { %v368_v49 = vadd.f32 %v367_v41, %v311_v42  ;;  %v354_v50 = vadd.f32 %v353_v47, %v269_v34  ;;  %v355_v51 = vpop.f32.mrb[6].mxu1  ;;  %v315_v52 = vpop.f32.mrb[7].mxu0 }
 0x170   :  { %v370_v53 = vadd.f32 %v367_v41, %v352_v45  ;;  %v369_v54 = vadd.f32 %v367_v41, %v313_v46  ;;  %v356_v55 = vpop.f32.mrb[7].mxu1 }
 0x171   :  { %v503_v56 = vmul.f32 -1.442695, %v368_v49  ;;  %v371_v57 = vadd.f32 %v367_v41, %v354_v50 }
 0x172   :  { %v505_v58 = vmul.f32 -1.442695, %v370_v53  ;;  %v504_v59 = vmul.f32 -1.442695, %v369_v54 }
 0x173   :  { %512 = vpow2.f32 %v503_v56  ;;  %v506_v60 = vmul.f32 -1.442695, %v371_v57 }
 0x174   :  { %514 = vpow2.f32 %v505_v58 }
 0x175   :  { %516 = vpow2.f32 %v504_v59 }
 0x176   :  { %518 = vpow2.f32 %v506_v60 }
 0x17d   :  { %v513_v61 = vpop.eup %512 }
 0x17e   :  { %v515_v62 = vpop.eup %514  ;;  %v384_v63 = vadd.f32 1.0, %v513_v61 }
 0x17f   :  { %v517_v0 = vpop.eup %516  ;;  %v386_v1 = vadd.f32 1.0, %v515_v62 }
 0x180   :  { %v519_v2 = vpop.eup %518  ;;  %520 = vrcp.f32 %v384_v63  ;;  %v385_v3 = vadd.f32 1.0, %v517_v0 }
 0x181   :  { %522 = vrcp.f32 %v386_v1  ;;  %v387_v4 = vadd.f32 1.0, %v519_v2 }
 0x182   :  { %524 = vrcp.f32 %v385_v3 }
 0x183   :  { %526 = vrcp.f32 %v387_v4 }
 0x18a   :  { %v521_v10 = vpop.eup %520 }
 0x18b   :  { %v523_v11 = vpop.eup %522 }
 0x18c   :  { %v525_v13 = vpop.eup %524 }
 0x18d   :  { %v527_v14 = vpop.eup %526  ;;  %v400_v15 = vcombine.low %v521_v10, %v525_v13 }
 0x18e   :  { %v401_v16 = vcombine.low %v523_v11, %v527_v14 }
 0x18f   :  { %v408_v17 = vrot.slane %v400_v15, %v407_v12 }
 0x190   :  { %v415_v18 = vrot.slane %v401_v16, %v407_v12 }
 0x192   :  { %v416_v19 = vcombine.low %v408_v17, %v415_v18 }
 0x194   :  { %v423_v20 = vrot.slane %v416_v19, %v407_v12 }
 0x196   :  { %429 = vst.msk [vmem:[%s667_s4] sm:$0xf] %vm427_vm11, %v423_v20 }

// kernel: edgenet2_forward.2
= control target key start
LH: loop header
LB: loop body
LE: loop exit
PB: predicated region body
PF: predicated region fallthrough
CT: control target
= control target key end

     0   :  { %vm1930_vm0 = vcmask 1042432   ;;  %vm1929_vm1 = vcmask 23552   ;;  %v1534_v0 = vmov 0.0   ;;  %vm1931_vm2 = vmmov 0   ;;  %v517_v62 = vld [vmem:[#allocation3 + $0x4] sm:$0xf]  ;;  %s1911_s0 = inlined_call_operand.vmem [shape: f32[3,32], index: 0, kind: input, shape index: {}]   ;;  %s1912_s1 = inlined_call_operand.vmem [shape: f32[8,3], index: 1, kind: input, shape index: {}]   ;;  %s1913_s2 = inlined_call_operand.vmem [shape: f32[8,1], index: 2, kind: input, shape index: {}]   ;;  %s1914_s4 = inlined_call_operand.vmem [shape: f32[8,1], index: 4, kind: input, shape index: {}]   ;;  %s1915_s3 = inlined_call_operand.vmem [shape: f32[8,1], index: 3, kind: input, shape index: {}]   ;;  %s1916_s14 = inlined_call_operand.vmem [shape: s32[32,1], index: 14, kind: input, shape index: {}]   ;;  %s1917_s9 = inlined_call_operand.vmem [shape: f32[15,1], index: 9, kind: input, shape index: {}]   ;;  %s1918_s11 = inlined_call_operand.vmem [shape: f32[8,1], index: 11, kind: input, shape index: {}]   ;;  %s1919_s15 = inlined_call_operand.vmem [shape: s32[2,512], index: 15, kind: input, shape index: {}]   ;;  %s1920_s8 = inlined_call_operand.vmem [shape: f32[15,3], index: 8, kind: input, shape index: {}]   ;;  %s1921_s6 = inlined_call_operand.vmem [shape: f32[15,3], index: 6, kind: input, shape index: {}]   ;;  %s1922_s7 = inlined_call_operand.vmem [shape: f32[15,8], index: 7, kind: input, shape index: {}]   ;;  %s1923_s5 = inlined_call_operand.vmem [shape: f32[15,8], index: 5, kind: input, shape index: {}]   ;;  %s1924_s10 = inlined_call_operand.vmem [shape: f32[8,15], index: 10, kind: input, shape index: {}]   ;;  %s1925_s13 = inlined_call_operand.vmem [shape: f32[2,3], index: 13, kind: input, shape index: {}]   ;;  %s1926_s12 = inlined_call_operand.vmem [shape: f32[2,8], index: 12, kind: input, shape index: {}]   ;;  %s1927_s16 = inlined_call_operand.vmem [shape: f32[2,32], index: 16, kind: output, shape index: {}]  }
   0x1   :  { %1939 = sst [smem:[#allocation5_spill]] %s1911_s0  ;;  %1462 = vmatprep.subr.mxu0 %v1534_v0  ;;  %1464 = vmatprep.mubr.msk.f32.mxu0 %vm1931_vm2, %v1534_v0  ;;  %v60_v2 = vld [vmem:[%s1912_s1] sm:$0xff]  ;;  %v1536_v4 = vmov 0   ;;  %v526_v8 = vld [vmem:[%s1916_s14 + $0x8] sm:$0xff]  ;;  %v527_v9 = vld [vmem:[%s1916_s14 + $0x10] sm:$0xff]  ;;  %v541_v14 = vlaneseq  ;;  %vm1933_vm3 = vcmask 64512  }
   0x2   :  { %s1940_s23 = sld [smem:[#allocation5_spill]]  ;;  %v61_v3 = vld [vmem:[%s1913_s2] sm:$0xff]  ;;  %1528 = vset.pattern.permute.xlu0 %v1536_v4  ;;  %1529 = vset.pattern.permute.xlu1 %v1536_v4  ;;  %v528_v10 = vld [vmem:[%s1916_s14 + $0x18] sm:$0xff]  ;;  %v879_v12 = vld [vmem:[%s1917_s9 + $0x8] sm:$0x7f]  ;;  %v1943_v39 = vmov 0 }
   0x3   :  { %v151_v5 = vld [vmem:[%s1914_s4] sm:$0xff]  ;;  %64 = vperm.xlu0 %1528, %v61_v3   ;;  %v1671_v15 = vshrl.u32 %v541_v14, 7  ;;  %v329_v22 = vld [vmem:[%s1920_s8 + $0x8] sm:$0x7f]  ;;  %v1945_v40 = vmov 0  ;;  %v1947_v41 = vmov 0 }
   0x4   :  { %v59_v6 = vld [vmem:[%s1915_s3] sm:$0xff]  ;;  %154 = vperm.xlu1 %1529, %v151_v5   ;;  %v162_v24 = vld [vmem:[%s1921_s6 + $0x8] sm:$0x7f]  ;;  %v1949_v42 = vmov 0  ;;  %v1951_v43 = vmov 0 }
   0x5   :  { %v525_v7 = vld [vmem:[%s1916_s14] sm:$0xff]  ;;  %v543_v16 = vsub.s32 0, %v1671_v15  ;;  %v551_v17 = vsub.s32 2, %v1671_v15  ;;  %v547_v30 = vsub.s32 1, %v1671_v15  ;;  %v555_v31 = vsub.s32 3, %v1671_v15 }
   0x6   :  { %v878_v11 = vld [vmem:[%s1917_s9] sm:$0xff]  ;;  %v327_v55 = vld [vmem:[%s1922_s7 + $0x8] sm:$0x7f]  ;;  %v1537_v58 = vmov 1.0|1.0  }
   0x7   :  { %147 = vperm.xlu0 %1528, %v59_v6   ;;  %v907_v13 = vld [vmem:[%s1918_s11] sm:$0xff]  ;;  %v160_v57 = vld [vmem:[%s1923_s5 + $0x8] sm:$0x7f] }
   0x8   :  { %v58_v1 = vld [vmem:[%s1940_s23] sm:$0x7]  ;;  %530 = vperm.xlu1 %1529, %v525_v7   ;;  %v505_v3 = vld [vmem:[#allocation2 + $0x4] sm:$0xf] }
   0x9   :  { %1463 = vmatpush3.msk.msra.mxu0 %vm1930_vm0, %v58_v1  ;;  %1467 = vmatprep.subr.msk.mxu1 %vm1930_vm0, %v58_v1  ;;  %v1344_v18 = vld [vmem:[%s1919_s15 + $0x1] ss:$2 sm:$0xf]  ;;  %v522_v49 = vld [vmem:[%s1919_s15] ss:$2 sm:$0xf] }
   0xa   :  { %1465 = vmatmul.mubr.msk.f32.vlgmr.msra.gmra.mrb[0].mxu0 %vm1929_vm1, %v60_v2  ;;  %1477 = vmatprep.subr.msk.mxu0 %vm1930_vm0, %v58_v1  ;;  %v544_v19 = vrot.slane %v1344_v18, %v543_v16  ;;  %v552_v20 = vrot.slane %v1344_v18, %v551_v17  ;;  %v328_v21 = vld [vmem:[%s1920_s8] sm:$0xff]  ;;  %v1708_v34 = vrot.slane %v1344_v18, %v547_v30 }
   0xb   :  { %1478 = vmatpush3.msk.msra.mxu0 %vm1930_vm0, %v58_v1  ;;  %1468 = vmatpush3.msk.msra.mxu1 %vm1930_vm0, %v58_v1  ;;  %v161_v23 = vld [vmem:[%s1921_s6] sm:$0xff]  ;;  %v1710_v35 = vrot.slane %v1344_v18, %v555_v31  ;;  %v620_v50 = vrot.slane %v522_v49, %v547_v30  ;;  %v628_v51 = vrot.slane %v522_v49, %v555_v31 }
   0xc   :  { %533 = vperm.xlu0 %1528, %v526_v8   ;;  %536 = vperm.xlu1 %1529, %v527_v9   ;;  %v326_v25 = vld [vmem:[%s1922_s7] sm:$0xff]  ;;  %v616_v52 = vrot.slane %v522_v49, %v543_v16  ;;  %v624_v53 = vrot.slane %v522_v49, %v551_v17 }
   0xd   :  { %1479 = vmatprep.mubr.msk.f32.mxu0 %vm1929_vm1, %v328_v21  ;;  %1469 = vmatprep.mubr.msk.f32.mxu1 %vm1929_vm1, %v161_v23  ;;  %v159_v26 = vld [vmem:[%s1923_s5] sm:$0xff] }
   0xe   :  { %1480 = vmatmul.mubr.msk.f32.vlgmr.msra.gmra.mrb[2].mxu0 %vm1929_vm1, %v329_v22  ;;  %1470 = vmatmul.mubr.msk.f32.vlgmr.msra.gmra.mrb[0].mxu1 %vm1929_vm1, %v162_v24 }
   0xf   :  { %1484 = vmatprep.mubr.msk.f32.mxu0 %vm1933_vm3, %v326_v25  ;;  %1474 = vmatprep.mubr.msk.f32.mxu1 %vm1933_vm3, %v159_v26 }
  0x10   :  { %539 = vperm.xlu0 %1528, %v528_v10   ;;  %882 = vperm.xlu1 %1529, %v878_v11  }
  0x14   :  { %887 = vperm.xlu0 %1528, %v879_v12   ;;  %910 = vperm.xlu1 %1529, %v907_v13  }
  0x82   :  { %v65_v27 = vpop.permute.xlu0 %64 }
  0x83   :  { %v155_v28 = vpop.permute.xlu1 %154 }
  0x86   :  { %v148_v29 = vpop.permute.xlu0 %147 }
  0x87   :  { %v1704_v32 = vpop.permute.xlu1 %530 }
  0x88   :  { %vm557_vm4 = vcmp.eq.s32.totalorder %v1704_v32, %v544_v19  ;;  %vm559_vm5 = vcmp.eq.s32.totalorder %v1704_v32, %v552_v20 }
  0x8b   :  { %v1706_v33 = vpop.permute.xlu0 %533  ;;  %v1716_v36 = vpop.permute.xlu1 %536 }
  0x8c   :  { %vm561_vm6 = vcmp.eq.s32.totalorder %v1706_v33, %v544_v19  ;;  %vm563_vm7 = vcmp.eq.s32.totalorder %v1706_v33, %v552_v20  ;;  %vm566_vm8 = vcmp.eq.s32.totalorder %v1716_v36, %v1708_v34  ;;  %vm568_vm9 = vcmp.eq.s32.totalorder %v1716_v36, %v1710_v35 }
  0x8d   :  { %vm565_vm10 = vcmp.eq.s32.totalorder %v1716_v36, %v544_v19  ;;  %vm567_vm11 = vcmp.eq.s32.totalorder %v1716_v36, %v552_v20  ;;  %vm1732_vm1 = vmpackc.low %vm561_vm6, %vm557_vm4 }
  0x8e   :  { %vm1736_vm0 = vmpackc.low %vm563_vm7, %vm559_vm5  ;;  %vm630_vm5 = vcmp.eq.s32.totalorder %v1704_v32, %v620_v50  ;;  %vm634_vm7 = vcmp.eq.s32.totalorder %v1706_v33, %v620_v50 }
  0x8f   :  { %v1724_v37 = vpop.permute.xlu0 %539  ;;  %v1944_v39 = vsel %vm1736_vm0, 4294967295, %v1943_v39  ;;  %vm558_vm0 = vcmp.eq.s32.totalorder %v1704_v32, %v1708_v34  ;;  %v883_v14 = vpop.permute.xlu1 %882 }
  0x90   :  { %vm570_vm12 = vcmp.eq.s32.totalorder %v1724_v37, %v1708_v34  ;;  %vm572_vm13 = vcmp.eq.s32.totalorder %v1724_v37, %v1710_v35  ;;  %vm569_vm14 = vcmp.eq.s32.totalorder %v1724_v37, %v544_v19  ;;  %vm571_vm15 = vcmp.eq.s32.totalorder %v1724_v37, %v552_v20 }
  0x91   :  { %vm1740_vm2 = vmpackc.low %vm570_vm12, %vm566_vm8  ;;  %vm632_vm8 = vcmp.eq.s32.totalorder %v1704_v32, %v628_v51 }
  0x92   :  { %v1946_v40 = vsel %vm1740_vm2, 4294967295, %v1945_v40  ;;  %vm1744_vm3 = vmpackc.low %vm572_vm13, %vm568_vm9  ;;  %vm636_vm9 = vcmp.eq.s32.totalorder %v1706_v33, %v628_v51  ;;  %vm639_vm2 = vcmp.eq.s32.totalorder %v1716_v36, %v624_v53 }
  0x93   :  { %v1948_v41 = vsel %vm1744_vm3, 4294967295, %v1947_v41  ;;  %vm1748_vm4 = vmpackc.low %vm569_vm14, %vm565_vm10  ;;  %vm644_vm14 = vcmp.eq.s32.totalorder %v1724_v37, %v628_v51  ;;  %vm637_vm3 = vcmp.eq.s32.totalorder %v1716_v36, %v616_v52  ;;  %v888_v13 = vpop.permute.xlu0 %887  ;;  %v911_v38 = vpop.permute.xlu1 %910 }
  0x94   :  { %v1950_v42 = vsel %vm1748_vm4, 4294967295, %v1949_v42  ;;  %vm1752_vm6 = vmpackc.low %vm571_vm15, %vm567_vm11  ;;  %vm633_vm11 = vcmp.eq.s32.totalorder %v1706_v33, %v616_v52  ;;  %vm1956_vm4 = vcmask 64512  }
  0x95   :  { %v1952_v43 = vsel %vm1752_vm6, 4294967295, %v1951_v43  ;;  %vm1768_vm12 = vmpackc.low %vm634_vm7, %vm630_vm5  ;;  %vm642_vm6 = vcmp.eq.s32.totalorder %v1724_v37, %v620_v50  ;;  %vm1955_vm5 = vcmp.eq.s32.totalorder %v1704_v32, %v616_v52 }
  0x96   :  { %vm1387_vm15 = vmpackc.low %vm636_vm9, %vm632_vm8  ;;  %vm1957_vm8 = vcmp.eq.s32.totalorder %v1704_v32, %v624_v53  ;;  %vm1958_vm9 = vcmp.eq.s32.totalorder %v1706_v33, %v624_v53 }
  0x97   :  { %vm1380_vm7 = vmpackc.low %vm633_vm11, %vm1955_vm5  ;;  %vm641_vm11 = vcmp.eq.s32.totalorder %v1724_v37, %v616_v52 }
  0x98   :  { %vm1389_vm10 = vmpackc.low %vm1958_vm9, %vm1957_vm8  ;;  %vm1961_vm8 = vcmp.eq.s32.totalorder %v1716_v36, %v628_v51 }
  0x99   :  { %vm1959_vm5 = vmmov %vm1956_vm4 }
  0x9a   :  { %vm1391_vm9 = vmpackc.low %vm644_vm14, %vm1961_vm8  ;;  %vm1968_vm8 = vnez %v1948_v41 }
  0xdd   :  { %v141_v44 = vpop.f32.mrb[0].mxu0 }
  0xde   :  { %v142_v45 = vadd.f32 %v141_v44, %v65_v27  ;;  %v1466_v46 = vpop.f32.mrb[1].mxu0 }
  0xe0   :  { %v150_v47 = vmul.f32 %v148_v29, %v142_v45 }
  0xe2   :  { %v157_v48 = vadd.f32 %v155_v28, %v150_v47 }
  0xe4   :  { %1532 = vtanh.f32 %v157_v48  ;;  %v906_v48 = vld [vmem:[%s1924_s10] sm:$0xff] }
  0xee   :  { %v1533_v54 = vpop.eup %1532 }
  0xef   :  { %1472 = vmatprep.subr.mxu1 %v1533_v54  ;;  %1482 = vmatprep.subr.mxu0 %v1533_v54 }
  0xf0   :  { %1473 = vmatpush3.msra.mxu1 %v1533_v54  ;;  %1483 = vmatpush3.msra.mxu0 %v1533_v54 }
  0xf1   :  { %1485 = vmatmul.mubr.msk.f32.vlgmr.msra.gmra.mrb[2].mxu0 %vm1956_vm4, %v327_v55  ;;  %1379 = vmatprep.subr.msk.bf16.mxu1 %vm1768_vm12, %v1537_v58  ;;  %vm1960_vm4 = vcmp.eq.s32.totalorder %v1716_v36, %v620_v50  ;;  %vm643_vm12 = vcmp.eq.s32.totalorder %v1724_v37, %v624_v53 }
  0xf2   :  { %1388 = vmatprep.subr.msk.bf16.mxu0 %vm1387_vm15, %v1537_v58  ;;  %1475 = vmatmul.mubr.msk.f32.vlgmr.msra.gmra.mrb[0].mxu1 %vm1959_vm5, %v160_v57  ;;  %vm1382_vm13 = vmpackc.low %vm642_vm6, %vm1960_vm4  ;;  %vm562_vm15 = vcmp.eq.s32.totalorder %v1706_v33, %v1708_v34  ;;  %vm560_vm5 = vcmp.eq.s32.totalorder %v1704_v32, %v1710_v35  ;;  %vm1966_vm4 = vnez %v1944_v39 }
  0xf3   :  { %1381 = vmatpush1.bf16.msk.msra.mxu1 %vm1380_vm7, %v1537_v58  ;;  %1390 = vmatpush1.bf16.msk.msra.mxu0 %vm1389_vm10, %v1537_v58  ;;  %vm1384_vm6 = vmpackc.low %vm641_vm11, %vm637_vm3  ;;  %vm564_vm10 = vcmp.eq.s32.totalorder %v1706_v33, %v1710_v35 }
  0xf4   :  { %1383 = vmatprep.subr.msk.bf16.mxu1 %vm1382_vm13, %v1537_v58  ;;  %1392 = vmatprep.subr.msk.bf16.mxu0 %vm1391_vm9, %v1537_v58  ;;  %vm1393_vm7 = vmpackc.low %vm643_vm12, %vm639_vm2  ;;  %vm500_vm2 = vcmask 257024   ;;  %vm503_vm13 = vsmask.f32 3328  ;;  %vm1967_vm12 = vnez %v1946_v40  ;;  %vm1969_vm9 = vnez %v1950_v42 }
  0xf5   :  { %730 = vmatprep.mubr.bf16.mxu1 %v1536_v4  ;;  %773 = vmatprep.mubr.bf16.mxu0 %v1536_v4  ;;  %vm1815_vm14 = vmpackc.low %vm562_vm15, %vm558_vm0  ;;  %vm520_vm0 = vcmask 261120   ;;  %vm1970_vm15 = vnez %v1952_v43 }
  0xf6   :  { %vm1821_vm3 = vmpackc.low %vm564_vm10, %vm560_vm5  ;;  %521 = vst.msk [vmem:[#allocation4] sm:$0xff] %vm520_vm0, %v1534_v0  ;;  %vm1538_vm5 = vmmov 1  }
  0xf7   :  { %1385 = vmatpush1.bf16.msk.msra.mxu1 %vm1384_vm6, %v1537_v58  ;;  %1394 = vmatpush1.bf16.msk.msra.mxu0 %vm1393_vm7, %v1537_v58  ;;  %vm504_vm11 = vmand %vm500_vm2, %vm503_vm13  ;;  %vm917_vm6 = vcmask 1046528   ;;  %vm913_vm7 = vcmask 121856   ;;  %vm1322_vm13 = vcmask 254976  }
  0xf8   :  { %1398 = vmatprep.subr.msk.bf16.mxu1 %vm1815_vm14, %v1537_v58  ;;  %1407 = vmatprep.subr.msk.bf16.mxu0 %vm1821_vm3, %v1537_v58  ;;  %vm1498_vm10 = vmpackc.low %vm917_vm6, %vm1538_vm5 }
 0x1c4   :  { %v1486_v61 = vpop.f32.mrb[2].mxu0 }
 0x1c5   :  { %v1443_v63 = vpack.c.bf16 %v1486_v61, %v1486_v61  ;;  %v483_v1 = vpop.f32.mrb[3].mxu0  ;;  %v1476_v2 = vpop.f32.mrb[0].mxu1  ;;  %v1168_v61 = vld [vmem:[%s1925_s13] sm:$0x3] }
 0x1c6   :  { %v1442_v5 = vpack.c.bf16 %v483_v1, %v483_v1  ;;  %v1441_v6 = vpack.c.bf16 %v1476_v2, %v1476_v2  ;;  %v317_v7 = vpop.f32.mrb[1].mxu1 }
 0x1c7   :  { %v518_v8 = vsel %vm504_vm11, %v1443_v63, %v517_v62  ;;  %v1440_v9 = vpack.c.bf16 %v317_v7, %v317_v7  ;;  %v1076_v63 = vld [vmem:[#allocation4] sm:$0xff] }
 0x1c8   :  { %516 = vst.msk [vmem:[#allocation3] sm:$0xf] %vm500_vm2, %v1442_v5  ;;  %519 = vst [vmem:[#allocation3 + $0x4] sm:$0xf] %v518_v8  ;;  %v506_v10 = vsel %vm504_vm11, %v1441_v6, %v505_v3 }
 0x1c9   :  { %507 = vst [vmem:[#allocation2 + $0x4] sm:$0xf] %v506_v10  ;;  %501 = vst.msk [vmem:[#allocation2] sm:$0xf] %vm500_vm2, %v1440_v9  ;;  %vm1974_vm2 = vcmask 64512  }
 0x1cf   :  { %v1530_v11 = vld [vmem:[#allocation3] sm:$0xff]  }
 0x1d0   :  { %1386 = vmatmul.mubr.msk.bf16.vlgmr.msra.gmra.mrb[4].mxu1 %vm520_vm0, %v1530_v11  ;;  %1395 = vmatmul.mubr.msk.bf16.vlgmr.msra.gmra.mrb[4].mxu0 %vm520_vm0, %v1530_v11  ;;  %v1531_v12 = vld [vmem:[#allocation2] sm:$0xff]  }
 0x1d1   :  { %1400 = vmatpush1.bf16.msk.msra.mxu1 %vm1732_vm1, %v1537_v58  ;;  %1409 = vmatpush1.bf16.msk.msra.mxu0 %vm1966_vm4, %v1537_v58  ;;  %v1166_v11 = vld [vmem:[%s1926_s12] sm:$0x3] }
 0x1d2   :  { %1402 = vmatprep.subr.msk.bf16.mxu1 %vm1967_vm12, %v1537_v58  ;;  %1411 = vmatprep.subr.msk.bf16.mxu0 %vm1968_vm8, %v1537_v58 }
 0x1d3   :  { %824 = vmatprep.mubr.bf16.mxu1 %v1536_v4  ;;  %867 = vmatprep.mubr.bf16.mxu0 %v1536_v4 }
 0x1d5   :  { %1404 = vmatpush1.bf16.msk.msra.mxu1 %vm1969_vm9, %v1537_v58  ;;  %1413 = vmatpush1.bf16.msk.msra.mxu0 %vm1970_vm15, %v1537_v58 }
 0x1dc   :  { %1405 = vmatmul.mubr.msk.bf16.vlgmr.msra.gmra.mrb[4].mxu1 %vm520_vm0, %v1531_v12  ;;  %1414 = vmatmul.mubr.msk.bf16.vlgmr.msra.gmra.mrb[4].mxu0 %vm520_vm0, %v1531_v12 }
 0x1dd   :  { %994 = vmatprep.mubr.f32.mxu1 %v1534_v0  ;;  %1065 = vmatprep.mubr.f32.mxu0 %v1534_v0 }
 0x2af   :  { %v826_v4 = vpop.f32.mrb[4].mxu1  ;;  %v869_v15 = vpop.f32.mrb[4].mxu0 }
 0x2b0   :  { %v890_v16 = vadd.f32 %v883_v14, %v826_v4  ;;  %v892_v17 = vadd.f32 %v883_v14, %v869_v15  ;;  %v828_v18 = vpop.f32.mrb[5].mxu1  ;;  %v871_v19 = vpop.f32.mrb[5].mxu0 }
 0x2b1   :  { %v891_v20 = vadd.f32 %v883_v14, %v828_v18  ;;  %v893_v21 = vadd.f32 %v883_v14, %v871_v19  ;;  %v830_v22 = vpop.f32.mrb[6].mxu1  ;;  %v873_v23 = vpop.f32.mrb[6].mxu0 }
 0x2b2   :  { %v894_v24 = vadd.f32 %v888_v13, %v830_v22  ;;  %v896_v25 = vadd.f32 %v888_v13, %v873_v23  ;;  %v832_v26 = vpop.f32.mrb[7].mxu1  ;;  %v875_v27 = vpop.f32.mrb[7].mxu0  ;;  %v898_v30 = vmax.f32 %v890_v16, 0.0  ;;  %v900_v31 = vmax.f32 %v892_v17, 0.0 }
 0x2b3   :  { %v895_v28 = vadd.f32 %v888_v13, %v832_v26  ;;  %v897_v29 = vadd.f32 %v888_v13, %v875_v27  ;;  %v899_v34 = vmax.f32 %v891_v20, 0.0  ;;  %v901_v35 = vmax.f32 %v893_v21, 0.0 }
 0x2b4   :  { %v902_v32 = vmax.f32 %v894_v24, 0.0  ;;  %v904_v33 = vmax.f32 %v896_v25, 0.0 }
 0x2b5   :  { %v903_v36 = vmax.f32 %v895_v28, 0.0  ;;  %v905_v37 = vmax.f32 %v897_v29, 0.0 }
 0x2b6   :  { %v1500_v44 = vpack.c.bf16 %v902_v32, %v898_v30  ;;  %v1506_v45 = vpack.c.bf16 %v904_v33, %v900_v31 }
 0x2b7   :  { %v1497_v46 = vpack.c.bf16 %v903_v36, %v899_v34  ;;  %v1503_v47 = vpack.c.bf16 %v905_v37, %v901_v35 }
 0x2b9   :  { %1499 = vmatprep.subr.msk.bf16.mxu1 %vm1498_vm10, %v1497_v46  ;;  %1505 = vmatprep.subr.msk.bf16.mxu0 %vm1498_vm10, %v1503_v47 }
 0x2ba   :  { %1502 = vmatpush1.bf16.msk.msra.mxu1 %vm1498_vm10, %v1500_v44  ;;  %1508 = vmatpush1.bf16.msk.msra.mxu0 %vm1498_vm10, %v1506_v45 }
 0x2bb   :  { %1422 = vmatprep.subr.msk.bf16.mxu1 %vm1815_vm14, %v1537_v58  ;;  %1430 = vmatprep.subr.msk.bf16.mxu0 %vm1821_vm3, %v1537_v58  ;;  %vm1972_vm14 = vcmask 1042432   ;;  %vm1973_vm3 = vcmask 23552  }
 0x2bd   :  { %1417 = vmatmul.mubr.msk.f32.vlgmr.msra.gmra.mrb[2].mxu1 %vm913_vm7, %v906_v48  ;;  %1420 = vmatmul.mubr.msk.f32.vlgmr.msra.gmra.mrb[8].mxu0 %vm913_vm7, %v906_v48 }
 0x2c3   :  { %1424 = vmatpush1.bf16.xpose.msk.msra.mxu1 %vm1732_vm1, %v1537_v58  ;;  %1432 = vmatpush1.bf16.xpose.msk.msra.mxu0 %vm1966_vm4, %v1537_v58  ;;  %vm1971_vm1 = vmmov 0  }
 0x2c4   :  { %1426 = vmatprep.subr.msk.bf16.mxu1 %vm1967_vm12, %v1537_v58  ;;  %1434 = vmatprep.subr.msk.bf16.mxu0 %vm1968_vm8, %v1537_v58 }
 0x2cb   :  { %1428 = vmatpush1.bf16.xpose.msk.msra.mxu1 %vm1969_vm9, %v1537_v58  ;;  %1436 = vmatpush1.bf16.xpose.msk.msra.mxu0 %vm1970_vm15, %v1537_v58  ;;  %v1169_v58 = vld [vmem:[%s1940_s23] sm:$0x7] }
 0x2cc   :  { %1487 = vmatprep.subr.mxu1 %v1534_v0 }
 0x390   :  { %v996_v39 = vpop.f32.mrb[2].mxu1  ;;  %v1067_v49 = vpop.f32.mrb[8].mxu0 }
 0x391   :  { %v997_v50 = vadd.f32 %v996_v39, %v911_v38  ;;  %v1068_v40 = vadd.f32 %v1067_v49, %v911_v38  ;;  %v998_v51 = vpop.f32.mrb[3].mxu1  ;;  %v1069_v52 = vpop.f32.mrb[9].mxu0 }
 0x392   :  { %v999_v53 = vadd.f32 %v998_v51, %v911_v38  ;;  %v1070_v41 = vadd.f32 %v1069_v52, %v911_v38 }
 0x393   :  { %v1072_v54 = vmax.f32 %v997_v50, 0.0  ;;  %v1074_v55 = vmax.f32 %v1068_v40, 0.0 }
 0x394   :  { %v1073_v56 = vmax.f32 %v999_v53, 0.0  ;;  %v1075_v42 = vmax.f32 %v1070_v41, 0.0 }
 0x395   :  { %v1077_v60 = vpack.c.bf16 %v1072_v54, %v1072_v54  ;;  %v1079_v43 = vpack.c.bf16 %v1074_v55, %v1074_v55 }
 0x396   :  { %v1078_v57 = vpack.c.bf16 %v1073_v56, %v1073_v56  ;;  %v1080_v59 = vpack.c.bf16 %v1075_v42, %v1075_v42 }
 0x398   :  { %1113 = vmatprep.mubr.bf16.mxu1 %v1078_v57  ;;  %1153 = vmatprep.mubr.bf16.mxu0 %v1080_v59 }
 0x399   :  { %1114 = vmatmul.mubr.bf16.vlgmr.msra.gmra.mrb[8].mxu1 %v1077_v60  ;;  %1154 = vmatmul.mubr.bf16.vlgmr.msra.gmra.mrb[12].mxu0 %v1079_v43 }
 0x39a   :  { %1489 = vmatprep.mubr.msk.f32.mxu1 %vm1971_vm1, %v1534_v0  ;;  %1488 = vmatpush3.msk.msra.mxu1 %vm1972_vm14, %v1169_v58 }
 0x39b   :  { %1492 = vmatprep.subr.mxu1 %v1534_v0 }
 0x3a1   :  { %1490 = vmatmul.mubr.msk.f32.vlgmr.msra.gmra.mrb[12].mxu1 %vm1973_vm3, %v1168_v61 }
 0x3a2   :  { %1494 = vmatprep.mubr.msk.f32.mxu1 %vm1971_vm1, %v1534_v0 }
 0x46c   :  { %v1115_v62 = vpop.f32.mrb[8].mxu1  ;;  %v1155_v1 = vpop.f32.mrb[12].mxu0 }
 0x46d   :  { %v1156_v2 = vadd.f32 %v1155_v1, %v1115_v62  ;;  %v1117_v3 = vpop.f32.mrb[9].mxu1  ;;  %v1157_v5 = vpop.f32.mrb[13].mxu0 }
 0x46e   :  { %v1118_v6 = vpop.f32.mrb[10].mxu1  ;;  %v1158_v7 = vpop.f32.mrb[14].mxu0 }
 0x46f   :  { %v1161_v8 = vadd.f32 %v1156_v2, %v1076_v63  ;;  %v1119_v9 = vpop.f32.mrb[11].mxu1  ;;  %v1159_v10 = vpop.f32.mrb[15].mxu0 }
 0x471   :  { %1162 = vst.msk [vmem:[#allocation4] sm:$0xff] %vm520_vm0, %v1161_v8 }
 0x478   :  { %v1167_v12 = vld [vmem:[#allocation4] sm:$0xff] }
 0x479   :  { %1493 = vmatpush3.msra.mxu1 %v1167_v12 }
 0x47a   :  { %1495 = vmatmul.mubr.msk.f32.vlgmr.msra.gmra.mrb[12].mxu1 %vm1974_vm2, %v1166_v11 }
 0x54d   :  { %v1318_v0 = vpop.f32.mrb[12].mxu1 }
 0x54e   :  { %1323 = vst.msk [vmem:[%s1927_s16] sm:$0x3] %vm1322_vm13, %v1318_v0  ;;  %v1496_v13 = vpop.f32.mrb[13].mxu1 }

</bundles_post_ra>
